<compile_context>
chip_gen: v5e
topology: v5e:2x2
jax: 0.10.0
libtpu: 0.0.40
codegen_flags: <defaults>
</compile_context>

<pallas_src>
import functools

import jax
import jax.numpy as jnp
from jax.experimental import pallas as pl
from jax.experimental.pallas import tpu as pltpu

HIDDEN = 64


def _round_up(n, m):
    return ((n + m - 1) // m) * m


def _default_pack():
    """MXU-filling row-pack factor: 2 on 128-wide MXUs (<= v5), 4 on 256-wide."""
    try:
        kind = jax.devices()[0].device_kind.lower()
        if any(v in kind for v in ("v2", "v3", "v4", "v5")):
            return 2
    except Exception:
        pass
    return 4


# ---------------------------------------------------------------------------
# Fused kernel: all three Linear+ReLU layers in one body; weights stay resident
# in VMEM and the hidden activations never touch HBM.
# ---------------------------------------------------------------------------
def _mlp3_kernel(x_ref, w1_ref, b1_ref, w2_ref, b2_ref, w3_ref, b3_ref, o_ref):
    h = jnp.dot(x_ref[...], w1_ref[...], preferred_element_type=jnp.float32)
    h = jnp.maximum(h + b1_ref[...], 0.0)                               # ReLU, f32 epilogue
    h = jnp.dot(h.astype(w2_ref.dtype), w2_ref[...],
                preferred_element_type=jnp.float32)
    h = jnp.maximum(h + b2_ref[...], 0.0)                               # ReLU, f32 epilogue
    h = jnp.dot(h.astype(w3_ref.dtype), w3_ref[...],
                preferred_element_type=jnp.float32)
    o_ref[...] = jnp.maximum(h + b3_ref[...], 0.0).astype(o_ref.dtype)  # final ReLU


def _fused_mlp(x, w1, b1, w2, b2, w3, b3, *, pack, block_m=1024):
    """x: (M, D_in) f32.  w*: block-diag packed (pack*in, pack*out) bf16.
    b*: (1, pack*out) f32.  Returns (M, D_out) f32."""
    M, d_in = x.shape
    pk_in, pk_h1 = w1.shape
    pk_h2 = w2.shape[1]
    pk_out = w3.shape[1]
    d_out = pk_out // pack
    compute_dtype = w1.dtype

    # --- row packing + padding so the fixed row tile divides evenly ---------
    rows = _round_up(M, pack) // pack               # packed rows needed
    bm = min(block_m, _round_up(rows, 8))           # row tile (multiple of 8 sublanes)
    rows_padded = _round_up(rows, bm)               # grid divides evenly, no bm=M fallback
    m_total = rows_padded * pack
    if m_total != M:
        x = jnp.pad(x, ((0, m_total - M), (0, 0)))
    # Free row-major view: `pack` consecutive rows per packed matmul row.
    xp = x.astype(compute_dtype).reshape(rows_padded, pk_in)

    grid = (rows_padded // bm,)
    full = lambda i: (0, 0)                         # weights / biases: resident block
    tile = lambda i: (i, 0)                         # x / out: tiled along packed rows

    # Advisory cost estimate (logical FLOPs / HBM bytes).
    flops = 2 * m_total * (d_in * HIDDEN + HIDDEN * HIDDEN + HIDDEN * d_out)
    bytes_accessed = (
        xp.size * xp.dtype.itemsize
        + m_total * d_out * 4
        + sum(a.size * a.dtype.itemsize for a in (w1, b1, w2, b2, w3, b3))
    )

    y = pl.pallas_call(
        _mlp3_kernel,
        out_shape=jax.ShapeDtypeStruct((rows_padded, pk_out), jnp.float32),
        grid=grid,
        in_specs=[
            pl.BlockSpec((bm, pk_in), tile),
            pl.BlockSpec((pk_in, pk_h1), full),
            pl.BlockSpec((1, pk_h1), full),
            pl.BlockSpec((pk_h1, pk_h2), full),
            pl.BlockSpec((1, pk_h2), full),
            pl.BlockSpec((pk_h2, pk_out), full),
            pl.BlockSpec((1, pk_out), full),
        ],
        out_specs=pl.BlockSpec((bm, pk_out), tile),
        compiler_params=pltpu.CompilerParams(
            dimension_semantics=("parallel",)),      # shard row tiles across TCs
        cost_estimate=pl.CostEstimate(
            flops=flops, transcendentals=0, bytes_accessed=bytes_accessed),
    )(xp, w1, b1, w2, b2, w3, b3)

    # Free row-major un-pack, then drop the padded rows.
    return y.reshape(m_total, d_out)[:M]


# ---------------------------------------------------------------------------
# Parameters.  Logical weights are (in, out) f32; pack_params builds the
# block-diagonal bf16 MXU-filling weights ONCE (outside the hot path).
# ---------------------------------------------------------------------------
def init_params(key, input_dim, output_dim, hidden=HIDDEN):
    ks = jax.random.split(key, 6)
    dims = [(input_dim, hidden), (hidden, hidden), (hidden, output_dim)]
    params = []
    for i, (din, dout) in enumerate(dims):
        w = 0.1 * jax.random.normal(ks[2 * i], (din, dout), jnp.float32)
        b = 0.1 * jax.random.normal(ks[2 * i + 1], (1, dout), jnp.float32)
        params.append((w, b))
    return params


def _block_diag(w, pack):
    din, dout = w.shape
    out = jnp.zeros((pack * din, pack * dout), w.dtype)
    for i in range(pack):
        out = out.at[i * din:(i + 1) * din, i * dout:(i + 1) * dout].set(w)
    return out


def pack_params(params, pack, compute_dtype=jnp.bfloat16):
    packed = []
    for w, b in params:
        wp = _block_diag(w, pack).astype(compute_dtype)   # (pack*in, pack*out)
        bp = jnp.tile(b, (1, pack)).astype(jnp.float32)   # (1, pack*out), f32 epilogue
        packed.append((wp, bp))
    return tuple(packed)


# ---------------------------------------------------------------------------
# Forward pass (handles arbitrary leading dims like nn.Linear does).
# ---------------------------------------------------------------------------
@functools.partial(jax.jit, static_argnames=("block_m",))
def mlp64_forward(packed_params, x, block_m=1024):
    (w1, b1), (w2, b2), (w3, b3) = packed_params
    d_in = x.shape[-1]
    pack = w1.shape[0] // d_in
    d_out = w3.shape[1] // pack
    lead = x.shape[:-1]
    x2 = x.reshape(-1, d_in).astype(jnp.float32)
    y = _fused_mlp(x2, w1, b1, w2, b2, w3, b3, pack=pack, block_m=block_m)
    return y.reshape(*lead, d_out)


# Pure-JAX references (for in-script correctness checks only).
def _reference(params, x, compute_dtype=jnp.float32):
    h = x
    for w, b in params:
        h = jnp.dot(h.astype(compute_dtype), w.astype(compute_dtype),
                    preferred_element_type=jnp.float32)
        h = jnp.maximum(h + b, 0.0)
    return h


if __name__ == "__main__":
    key = jax.random.PRNGKey(0)
    pkey, xkey = jax.random.split(key)

    batch, input_dim, output_dim = 2, 32, 64
    params = init_params(pkey, input_dim, output_dim)
    pack = _default_pack()
    packed_params = pack_params(params, pack)

    x = jax.random.normal(xkey, (batch, input_dim), jnp.float32)

    y = mlp64_forward(packed_params, x)
    jax.block_until_ready(y)

    assert y.shape == (batch, output_dim)
    assert bool(jnp.all(jnp.isfinite(y)))
    assert bool(jnp.all(y >= 0.0))                            # final ReLU range

    # Cast-matched reference (same bf16 weights/activations, f32 accumulation).
    y_bf = _reference(params, x, compute_dtype=jnp.bfloat16)
    assert bool(jnp.max(jnp.abs(y - y_bf)) < 5e-3)

    # Full-f32 (PyTorch-semantics) reference: looser tol for the bf16 MXU path.
    y_f32 = _reference(params, x, compute_dtype=jnp.float32)
    assert bool(jnp.max(jnp.abs(y - y_f32)) < 5e-2)

    print("KERNEL_OK")
</pallas_src>

<mosaic_0001>
module attributes {stable_mosaic.version = 11 : i64} {
  func.func @_mlp3_kernel(%arg0: i32, %arg1: memref<8x128xbf16, #tpu.memory_space<vmem>>, %arg2: memref<128x256xbf16, #tpu.memory_space<vmem>>, %arg3: memref<1x256xf32, #tpu.memory_space<vmem>>, %arg4: memref<256x256xbf16, #tpu.memory_space<vmem>>, %arg5: memref<1x256xf32, #tpu.memory_space<vmem>>, %arg6: memref<256x256xbf16, #tpu.memory_space<vmem>>, %arg7: memref<1x256xf32, #tpu.memory_space<vmem>>, %arg8: memref<8x256xf32, #tpu.memory_space<vmem>>) attributes {dimension_semantics = [#tpu.dimension_semantics<parallel>], iteration_bounds = array<i64: 1>, scalar_prefetch = 0 : i64, scratch_operands = 0 : i64, tpu.core_type = #tpu.core_type<tc>, window_params = [{transform_indices = @transform_0, window_bounds = array<i64: 8, 128>}, {pipeline_mode = #tpu.pipeline_mode<synchronous>, transform_indices = @transform_1, window_bounds = array<i64: 128, 256>}, {pipeline_mode = #tpu.pipeline_mode<synchronous>, transform_indices = @transform_2, window_bounds = array<i64: 1, 256>}, {pipeline_mode = #tpu.pipeline_mode<synchronous>, transform_indices = @transform_3, window_bounds = array<i64: 256, 256>}, {pipeline_mode = #tpu.pipeline_mode<synchronous>, transform_indices = @transform_4, window_bounds = array<i64: 1, 256>}, {pipeline_mode = #tpu.pipeline_mode<synchronous>, transform_indices = @transform_5, window_bounds = array<i64: 256, 256>}, {pipeline_mode = #tpu.pipeline_mode<synchronous>, transform_indices = @transform_6, window_bounds = array<i64: 1, 256>}, {transform_indices = @transform_7, window_bounds = array<i64: 8, 256>}]} {
    %c0 = arith.constant 0 : index
    %c0_0 = arith.constant 0 : index
    %0 = vector.load %arg1[%c0, %c0_0] : memref<8x128xbf16, #tpu.memory_space<vmem>>, vector<8x128xbf16>
    %c0_1 = arith.constant 0 : index
    %c0_2 = arith.constant 0 : index
    %1 = vector.load %arg2[%c0_1, %c0_2] : memref<128x256xbf16, #tpu.memory_space<vmem>>, vector<128x256xbf16>
    %cst = arith.constant dense<0.000000e+00> : vector<8x256xf32>
    %2 = tpu.matmul %0, %1, %cst {dimension_numbers = #tpu.dot_dimension_numbers<[1], [0], [0], [1], [0, 0, 1, 1], [], []>} : vector<8x128xbf16>, vector<128x256xbf16>, vector<8x256xf32> -> vector<8x256xf32>
    %c0_3 = arith.constant 0 : index
    %c0_4 = arith.constant 0 : index
    %3 = vector.load %arg3[%c0_3, %c0_4] : memref<1x256xf32, #tpu.memory_space<vmem>>, vector<1x256xf32>
    %4 = vector.broadcast %3 : vector<1x256xf32> to vector<8x256xf32>
    %5 = arith.addf %2, %4 : vector<8x256xf32>
    %cst_5 = arith.constant 0.000000e+00 : f32
    %6 = vector.broadcast %cst_5 : f32 to vector<8x256xf32>
    %7 = arith.maximumf %5, %6 : vector<8x256xf32>
    %8 = arith.truncf %7 : vector<8x256xf32> to vector<8x256xbf16>
    %c0_6 = arith.constant 0 : index
    %c0_7 = arith.constant 0 : index
    %9 = vector.load %arg4[%c0_6, %c0_7] : memref<256x256xbf16, #tpu.memory_space<vmem>>, vector<256x256xbf16>
    %cst_8 = arith.constant dense<0.000000e+00> : vector<8x256xf32>
    %10 = tpu.matmul %8, %9, %cst_8 {dimension_numbers = #tpu.dot_dimension_numbers<[1], [0], [0], [1], [0, 0, 1, 1], [], []>} : vector<8x256xbf16>, vector<256x256xbf16>, vector<8x256xf32> -> vector<8x256xf32>
    %c0_9 = arith.constant 0 : index
    %c0_10 = arith.constant 0 : index
    %11 = vector.load %arg5[%c0_9, %c0_10] : memref<1x256xf32, #tpu.memory_space<vmem>>, vector<1x256xf32>
    %12 = vector.broadcast %11 : vector<1x256xf32> to vector<8x256xf32>
    %13 = arith.addf %10, %12 : vector<8x256xf32>
    %cst_11 = arith.constant 0.000000e+00 : f32
    %14 = vector.broadcast %cst_11 : f32 to vector<8x256xf32>
    %15 = arith.maximumf %13, %14 : vector<8x256xf32>
    %16 = arith.truncf %15 : vector<8x256xf32> to vector<8x256xbf16>
    %c0_12 = arith.constant 0 : index
    %c0_13 = arith.constant 0 : index
    %17 = vector.load %arg6[%c0_12, %c0_13] : memref<256x256xbf16, #tpu.memory_space<vmem>>, vector<256x256xbf16>
    %cst_14 = arith.constant dense<0.000000e+00> : vector<8x256xf32>
    %18 = tpu.matmul %16, %17, %cst_14 {dimension_numbers = #tpu.dot_dimension_numbers<[1], [0], [0], [1], [0, 0, 1, 1], [], []>} : vector<8x256xbf16>, vector<256x256xbf16>, vector<8x256xf32> -> vector<8x256xf32>
    %c0_15 = arith.constant 0 : index
    %c0_16 = arith.constant 0 : index
    %19 = vector.load %arg7[%c0_15, %c0_16] : memref<1x256xf32, #tpu.memory_space<vmem>>, vector<1x256xf32>
    %20 = vector.broadcast %19 : vector<1x256xf32> to vector<8x256xf32>
    %21 = arith.addf %18, %20 : vector<8x256xf32>
    %cst_17 = arith.constant 0.000000e+00 : f32
    %22 = vector.broadcast %cst_17 : f32 to vector<8x256xf32>
    %23 = arith.maximumf %21, %22 : vector<8x256xf32>
    %c0_18 = arith.constant 0 : index
    %c0_19 = arith.constant 0 : index
    %24 = vector.load %arg8[%c0_18, %c0_19] : memref<8x256xf32, #tpu.memory_space<vmem>>, vector<8x256xf32>
    tpu.vector_store %arg8[%c0_18, %c0_19], %23 {strides = array<i32>} : memref<8x256xf32, #tpu.memory_space<vmem>>, vector<8x256xf32>,
    return
  }
  func.func @transform_0(%arg0: i32) -> (i32, i32) {
    %c0_i32 = arith.constant 0 : i32
    %c0_i32_0 = arith.constant 0 : i32
    return %arg0, %c0_i32 : i32, i32
  }
  func.func @transform_1(%arg0: i32) -> (i32, i32) {
    %c0_i32 = arith.constant 0 : i32
    %c0_i32_0 = arith.constant 0 : i32
    %c0_i32_1 = arith.constant 0 : i32
    return %c0_i32, %c0_i32_0 : i32, i32
  }
  func.func @transform_2(%arg0: i32) -> (i32, i32) {
    %c0_i32 = arith.constant 0 : i32
    %c0_i32_0 = arith.constant 0 : i32
    %c0_i32_1 = arith.constant 0 : i32
    return %c0_i32, %c0_i32_0 : i32, i32
  }
  func.func @transform_3(%arg0: i32) -> (i32, i32) {
    %c0_i32 = arith.constant 0 : i32
    %c0_i32_0 = arith.constant 0 : i32
    %c0_i32_1 = arith.constant 0 : i32
    return %c0_i32, %c0_i32_0 : i32, i32
  }
  func.func @transform_4(%arg0: i32) -> (i32, i32) {
    %c0_i32 = arith.constant 0 : i32
    %c0_i32_0 = arith.constant 0 : i32
    %c0_i32_1 = arith.constant 0 : i32
    return %c0_i32, %c0_i32_0 : i32, i32
  }
  func.func @transform_5(%arg0: i32) -> (i32, i32) {
    %c0_i32 = arith.constant 0 : i32
    %c0_i32_0 = arith.constant 0 : i32
    %c0_i32_1 = arith.constant 0 : i32
    return %c0_i32, %c0_i32_0 : i32, i32
  }
  func.func @transform_6(%arg0: i32) -> (i32, i32) {
    %c0_i32 = arith.constant 0 : i32
    %c0_i32_0 = arith.constant 0 : i32
    %c0_i32_1 = arith.constant 0 : i32
    return %c0_i32, %c0_i32_0 : i32, i32
  }
  func.func @transform_7(%arg0: i32) -> (i32, i32) {
    %c0_i32 = arith.constant 0 : i32
    %c0_i32_0 = arith.constant 0 : i32
    return %arg0, %c0_i32 : i32, i32
  }
}

</mosaic_0001>

<bundles_post_ra>
// kernel: mlp64_forward.1
= control target key start
LH: loop header
LB: loop body
LE: loop exit
PB: predicated region body
PF: predicated region fallthrough
CT: control target
= control target key end

     0   :  { %12 = vsyncpa [#allocation3], 0  ;;  %s1273_s0 = inlined_call_operand.vmem [shape: bf16[8,128], index: 0, kind: input, shape index: {}]   ;;  %s1274_s1 = inlined_call_operand.hbm [shape: bf16[128,256], index: 1, kind: input, shape index: {}]   ;;  %s1275_s2 = inlined_call_operand.vmem [shape: f32[1,256], index: 2, kind: input, shape index: {}]   ;;  %s1276_s3 = inlined_call_operand.hbm [shape: bf16[256,256], index: 3, kind: input, shape index: {}]   ;;  %s1277_s4 = inlined_call_operand.vmem [shape: f32[1,256], index: 4, kind: input, shape index: {}]   ;;  %s1278_s5 = inlined_call_operand.hbm [shape: bf16[256,256], index: 5, kind: input, shape index: {}]   ;;  %s1279_s6 = inlined_call_operand.vmem [shape: f32[1,256], index: 6, kind: input, shape index: {}]   ;;  %s1280_s7 = inlined_call_operand.vmem [shape: f32[8,256], index: 7, kind: output, shape index: {}]  }
   0x1   :  { %13 = vsyncpa [#allocation5], 0  ;;  %s35_s26 = sshll.u32 %s1276_s3, 4  ;;  %s1201_s27 = smov [#allocation4]   ;;  %s36_s26 = int_to_ptr.hbm [resolvable:$true] %s35_s26 }
   0x2   :  { %s37_s28 = sshll.u32 %s1201_s27, 4  ;;  %s20_s8 = sshll.u32 %s1274_s1, 4  ;;  %s38_s28 = int_to_ptr.vmem [resolvable:$true] %s37_s28  ;;  %s21_s8 = int_to_ptr.hbm [resolvable:$true] %s20_s8 }
   0x3   :  { %s1202_s9 = smov 128   ;;  %s1203_s10 = smov 8  }
   0x4   :  { %43 = dma.hbm_to_vmem [thread:$0]  %s36_s26, 4096, %s38_s28, [#allocation5], %s1202_s9, %s1202_s9, %s1203_s10  }
   0x5   :  { %s1204_s11 = smov [#allocation2]   ;;  %s50_s15 = sshll.u32 %s1278_s5, 4  ;;  %s51_s15 = int_to_ptr.hbm [resolvable:$true] %s50_s15 }
   0x6   :  { %s22_s12 = sshll.u32 %s1204_s11, 4  ;;  %s1205_s3 = smov [#allocation6]   ;;  %s23_s12 = int_to_ptr.vmem [resolvable:$true] %s22_s12 }
   0x7   :  { %28 = dma.hbm_to_vmem [thread:$0]  %s21_s8, 2048, %s23_s12, [#allocation3], %s1202_s9, %s1202_s9, %s1203_s10  }
   0x8   :  { %s52_s16 = sshll.u32 %s1205_s3, 4  ;;  %s53_s16 = int_to_ptr.vmem [resolvable:$true] %s52_s16 }
   0x9   :  { %58 = dma.hbm_to_vmem [thread:$0]  %s51_s15, 4096, %s53_s16, [#allocation5], %s1202_s9, %s1202_s9, %s1203_s10  }
   0xa   :  { %1197 = dma.done.wait [#allocation3], 2048  }
   0xb   :  { %1198 = vsyncadd [#allocation3], 4294965248 }
   0xc   :  { %1199 = dma.done.wait [#allocation5], 8192  }
   0xd   :  { %1200 = vsyncadd [#allocation5], 4294959104  ;;  %v778_v0 = vld [vmem:[#allocation2 + $0x70] sm:$0xf]  ;;  %v1055_v1 = vld [vmem:[#allocation2 + $0x74] sm:$0xf0] }
   0xe   :  { %v1054_v2 = vld [vmem:[#allocation2 + $0x74] sm:$0xf]  ;;  %v779_v3 = vor.u32 %v1055_v1, %v778_v0  ;;  %v780_v4 = vld [vmem:[#allocation2 + $0x78] sm:$0xf0]  ;;  %v770_v5 = vld [vmem:[#allocation2 + $0x60] sm:$0xf] }
   0xf   :  { %v1053_v6 = vld [vmem:[#allocation2 + $0x64] sm:$0xf0]  ;;  %v783_v7 = vor.u32 %v1054_v2, %v780_v4  ;;  %v1052_v8 = vld [vmem:[#allocation2 + $0x64] sm:$0xf]  ;;  %v772_v9 = vld [vmem:[#allocation2 + $0x68] sm:$0xf0] }
  0x10   :  { %176 = vmatpush.bf16.msra.mxu0 %v779_v3  ;;  %v771_v10 = vor.u32 %v1053_v6, %v770_v5  ;;  %v775_v11 = vor.u32 %v1052_v8, %v772_v9  ;;  %v762_v12 = vld [vmem:[#allocation2 + $0x50] sm:$0xf]  ;;  %v1051_v13 = vld [vmem:[#allocation2 + $0x54] sm:$0xf0]  ;;  %v1050_v14 = vld [vmem:[#allocation2 + $0x54] sm:$0xf] }
  0x11   :  { %189 = vmatpush.bf16.msra.mxu1 %v783_v7  ;;  %v764_v15 = vld [vmem:[#allocation2 + $0x58] sm:$0xf0]  ;;  %v763_v16 = vor.u32 %v1051_v13, %v762_v12  ;;  %v754_v18 = vld [vmem:[#allocation2 + $0x40] sm:$0xf]  ;;  %v1049_v19 = vld [vmem:[#allocation2 + $0x44] sm:$0xf0] }
  0x12   :  { %v767_v17 = vor.u32 %v1050_v14, %v764_v15  ;;  %v1048_v20 = vld [vmem:[#allocation2 + $0x44] sm:$0xf]  ;;  %v756_v21 = vld [vmem:[#allocation2 + $0x48] sm:$0xf0]  ;;  %v755_v22 = vor.u32 %v1049_v19, %v754_v18  ;;  %v842_v23 = vld [vmem:[#allocation4 + $0x70] sm:$0xf] }
  0x13   :  { %v1071_v24 = vld [vmem:[#allocation4 + $0x74] sm:$0xf0]  ;;  %v906_v25 = vld [vmem:[#allocation4 + $0xf0] sm:$0xf]  ;;  %v759_v26 = vor.u32 %v1048_v20, %v756_v21  ;;  %v1046_v31 = vld [vmem:[#allocation2 + $0x34] sm:$0xf] }
  0x14   :  { %177 = vmatpush.bf16.msra.mxu0 %v771_v10  ;;  %v746_v27 = vld [vmem:[#allocation2 + $0x30] sm:$0xf]  ;;  %v1047_v28 = vld [vmem:[#allocation2 + $0x34] sm:$0xf0]  ;;  %v843_v29 = vor.u32 %v1071_v24, %v842_v23  ;;  %v748_v32 = vld [vmem:[#allocation2 + $0x38] sm:$0xf0] }
  0x15   :  { %190 = vmatpush.bf16.msra.mxu1 %v775_v11  ;;  %v1087_v30 = vld [vmem:[#allocation4 + $0xf4] sm:$0xf0]  ;;  %v834_v34 = vld [vmem:[#allocation4 + $0x60] sm:$0xf]  ;;  %v1069_v35 = vld [vmem:[#allocation4 + $0x64] sm:$0xf0]  ;;  %v747_v38 = vor.u32 %v1047_v28, %v746_v27  ;;  %v751_v43 = vor.u32 %v1046_v31, %v748_v32 }
  0x16   :  { %v907_v33 = vor.u32 %v1087_v30, %v906_v25  ;;  %404 = vmatpush.bf16.msra.mxu2 %v843_v29  ;;  %v898_v36 = vld [vmem:[#allocation4 + $0xe0] sm:$0xf]  ;;  %v1085_v37 = vld [vmem:[#allocation4 + $0xe4] sm:$0xf0]  ;;  %v835_v41 = vor.u32 %v1069_v35, %v834_v34  ;;  %v1044_v44 = vld [vmem:[#allocation2 + $0x24] sm:$0xf] }
  0x17   :  { %v738_v39 = vld [vmem:[#allocation2 + $0x20] sm:$0xf]  ;;  %v1045_v40 = vld [vmem:[#allocation2 + $0x24] sm:$0xf0]  ;;  %v899_v42 = vor.u32 %v1085_v37, %v898_v36  ;;  %v826_v45 = vld [vmem:[#allocation4 + $0x50] sm:$0xf] }
  0x18   :  { %178 = vmatpush.bf16.msra.mxu0 %v763_v16  ;;  %417 = vmatpush.bf16.msra.mxu3 %v907_v33  ;;  %v1067_v46 = vld [vmem:[#allocation4 + $0x54] sm:$0xf0]  ;;  %v740_v47 = vld [vmem:[#allocation2 + $0x28] sm:$0xf0]  ;;  %v890_v48 = vld [vmem:[#allocation4 + $0xd0] sm:$0xf]  ;;  %v739_v51 = vor.u32 %v1045_v40, %v738_v39 }
  0x19   :  { %191 = vmatpush.bf16.msra.mxu1 %v767_v17  ;;  %v1083_v49 = vld [vmem:[#allocation4 + $0xd4] sm:$0xf0]  ;;  %v827_v50 = vor.u32 %v1067_v46, %v826_v45  ;;  %v730_v52 = vld [vmem:[#allocation2 + $0x10] sm:$0xf]  ;;  %v818_v54 = vld [vmem:[#allocation4 + $0x40] sm:$0xf]  ;;  %v743_v56 = vor.u32 %v1044_v44, %v740_v47 }
  0x1a   :  { %405 = vmatpush.bf16.msra.mxu2 %v835_v41  ;;  %v891_v53 = vor.u32 %v1083_v49, %v890_v48  ;;  %v1065_v55 = vld [vmem:[#allocation4 + $0x44] sm:$0xf0]  ;;  %v1043_v57 = vld [vmem:[#allocation2 + $0x14] sm:$0xf0]  ;;  %v882_v58 = vld [vmem:[#allocation4 + $0xc0] sm:$0xf] }
  0x1b   :  { %v1081_v59 = vld [vmem:[#allocation4 + $0xc4] sm:$0xf0]  ;;  %v1042_v60 = vld [vmem:[#allocation2 + $0x14] sm:$0xf]  ;;  %v732_v61 = vld [vmem:[#allocation2 + $0x18] sm:$0xf0]  ;;  %v819_v63 = vor.u32 %v1065_v55, %v818_v54  ;;  %v731_v0 = vor.u32 %v1043_v57, %v730_v52 }
  0x1c   :  { %179 = vmatpush.bf16.msra.mxu0 %v755_v22  ;;  %418 = vmatpush.bf16.msra.mxu3 %v899_v42  ;;  %v722_v62 = vld [vmem:[#allocation2] sm:$0xf]  ;;  %v1041_v1 = vld [vmem:[#allocation2 + $0x4] sm:$0xf0]  ;;  %v883_v2 = vor.u32 %v1081_v59, %v882_v58  ;;  %v810_v3 = vld [vmem:[#allocation4 + $0x30] sm:$0xf]  ;;  %v735_v5 = vor.u32 %v1042_v60, %v732_v61 }
  0x1d   :  { %192 = vmatpush.bf16.msra.mxu1 %v759_v26  ;;  %v1063_v4 = vld [vmem:[#allocation4 + $0x34] sm:$0xf0]  ;;  %v1040_v6 = vld [vmem:[#allocation2 + $0x4] sm:$0xf]  ;;  %v874_v7 = vld [vmem:[#allocation4 + $0xb0] sm:$0xf]  ;;  %v723_v15 = vor.u32 %v1041_v1, %v722_v62 }
  0x1e   :  { %406 = vmatpush.bf16.msra.mxu2 %v827_v50  ;;  %v1079_v8 = vld [vmem:[#allocation4 + $0xb4] sm:$0xf0]  ;;  %v724_v9 = vld [vmem:[#allocation2 + $0x8] sm:$0xf0]  ;;  %v1070_v10 = vld [vmem:[#allocation4 + $0x74] sm:$0xf]  ;;  %v811_v14 = vor.u32 %v1063_v4, %v810_v3 }
  0x1f   :  { %v844_v11 = vld [vmem:[#allocation4 + $0x78] sm:$0xf0]  ;;  %v1086_v12 = vld [vmem:[#allocation4 + $0xf4] sm:$0xf]  ;;  %v875_v16 = vor.u32 %v1079_v8, %v874_v7  ;;  %v802_v17 = vld [vmem:[#allocation4 + $0x20] sm:$0xf]  ;;  %v727_v19 = vor.u32 %v1040_v6, %v724_v9 }
  0x20   :  { %180 = vmatpush.bf16.msra.mxu0 %v747_v38  ;;  %419 = vmatpush.bf16.msra.mxu3 %v891_v53  ;;  %v908_v13 = vld [vmem:[#allocation4 + $0xf8] sm:$0xf0]  ;;  %v1061_v18 = vld [vmem:[#allocation4 + $0x24] sm:$0xf0]  ;;  %v847_v20 = vor.u32 %v1070_v10, %v844_v11  ;;  %v866_v21 = vld [vmem:[#allocation4 + $0xa0] sm:$0xf] }
  0x21   :  { %193 = vmatpush.bf16.msra.mxu1 %v751_v43  ;;  %v1077_v22 = vld [vmem:[#allocation4 + $0xa4] sm:$0xf0]  ;;  %v911_v23 = vor.u32 %v1086_v12, %v908_v13  ;;  %v1068_v24 = vld [vmem:[#allocation4 + $0x64] sm:$0xf]  ;;  %v836_v25 = vld [vmem:[#allocation4 + $0x68] sm:$0xf0]  ;;  %v803_v28 = vor.u32 %v1061_v18, %v802_v17 }
  0x22   :  { %407 = vmatpush.bf16.msra.mxu2 %v819_v63  ;;  %v1084_v26 = vld [vmem:[#allocation4 + $0xe4] sm:$0xf]  ;;  %v900_v27 = vld [vmem:[#allocation4 + $0xe8] sm:$0xf0]  ;;  %v73_v29 = vld [vmem:[%s1273_s0] sm:$0xf]  ;;  %v867_v30 = vor.u32 %v1077_v22, %v866_v21  ;;  %v839_v31 = vor.u32 %v1068_v24, %v836_v25 }
  0x23   :  { %v903_v32 = vor.u32 %v1084_v26, %v900_v27  ;;  %v1066_v33 = vld [vmem:[#allocation4 + $0x54] sm:$0xf]  ;;  %v828_v34 = vld [vmem:[#allocation4 + $0x58] sm:$0xf0]  ;;  %v1064_v39 = vld [vmem:[#allocation4 + $0x44] sm:$0xf] }
  0x24   :  { %181 = vmatpush.bf16.msra.mxu0 %v739_v51  ;;  %420 = vmatpush.bf16.msra.mxu3 %v883_v2  ;;  %v1082_v35 = vld [vmem:[#allocation4 + $0xd4] sm:$0xf]  ;;  %v892_v36 = vld [vmem:[#allocation4 + $0xd8] sm:$0xf0]  ;;  %v831_v37 = vor.u32 %v1066_v33, %v828_v34  ;;  %v820_v40 = vld [vmem:[#allocation4 + $0x48] sm:$0xf0] }
  0x25   :  { %194 = vmatpush.bf16.msra.mxu1 %v743_v56  ;;  %v895_v38 = vor.u32 %v1082_v35, %v892_v36  ;;  %v1080_v41 = vld [vmem:[#allocation4 + $0xc4] sm:$0xf]  ;;  %v884_v42 = vld [vmem:[#allocation4 + $0xc8] sm:$0xf0]  ;;  %v823_v43 = vor.u32 %v1064_v39, %v820_v40  ;;  %v1062_v45 = vld [vmem:[#allocation4 + $0x34] sm:$0xf] }
  0x26   :  { %408 = vmatpush.bf16.msra.mxu2 %v811_v14  ;;  %v887_v44 = vor.u32 %v1080_v41, %v884_v42  ;;  %v812_v46 = vld [vmem:[#allocation4 + $0x38] sm:$0xf0]  ;;  %v1078_v47 = vld [vmem:[#allocation4 + $0xb4] sm:$0xf]  ;;  %v1060_v51 = vld [vmem:[#allocation4 + $0x24] sm:$0xf] }
  0x27   :  { %v876_v48 = vld [vmem:[#allocation4 + $0xb8] sm:$0xf0]  ;;  %v815_v49 = vor.u32 %v1062_v45, %v812_v46  ;;  %v804_v52 = vld [vmem:[#allocation4 + $0x28] sm:$0xf0]  ;;  %v1076_v53 = vld [vmem:[#allocation4 + $0xa4] sm:$0xf] }
  0x28   :  { %182 = vmatpush.bf16.msra.mxu0 %v731_v0  ;;  %421 = vmatpush.bf16.msra.mxu3 %v875_v16  ;;  %v879_v50 = vor.u32 %v1078_v47, %v876_v48  ;;  %v868_v54 = vld [vmem:[#allocation4 + $0xa8] sm:$0xf0]  ;;  %v807_v55 = vor.u32 %v1060_v51, %v804_v52  ;;  %v794_v57 = vld [vmem:[#allocation4 + $0x10] sm:$0xf]  ;;  %v1059_v58 = vld [vmem:[#allocation4 + $0x14] sm:$0xf0] }
  0x29   :  { %195 = vmatpush.bf16.msra.mxu1 %v735_v5  ;;  %v871_v56 = vor.u32 %v1076_v53, %v868_v54  ;;  %v858_v59 = vld [vmem:[#allocation4 + $0x90] sm:$0xf]  ;;  %v795_v60 = vor.u32 %v1059_v58, %v794_v57  ;;  %v1075_v61 = vld [vmem:[#allocation4 + $0x94] sm:$0xf0]  ;;  %v1058_v62 = vld [vmem:[#allocation4 + $0x14] sm:$0xf] }
  0x2a   :  { %409 = vmatpush.bf16.msra.mxu2 %v803_v28  ;;  %v796_v63 = vld [vmem:[#allocation4 + $0x18] sm:$0xf0]  ;;  %v859_v0 = vor.u32 %v1075_v61, %v858_v59  ;;  %v1074_v2 = vld [vmem:[#allocation4 + $0x94] sm:$0xf]  ;;  %v786_v5 = vld [vmem:[#allocation4] sm:$0xf] }
  0x2b   :  { %v799_v1 = vor.u32 %v1058_v62, %v796_v63  ;;  %v860_v3 = vld [vmem:[#allocation4 + $0x98] sm:$0xf0]  ;;  %v1057_v6 = vld [vmem:[#allocation4 + $0x4] sm:$0xf0]  ;;  %v850_v7 = vld [vmem:[#allocation4 + $0x80] sm:$0xf] }
  0x2c   :  { %183 = vmatpush.bf16.msra.mxu0 %v723_v15  ;;  %422 = vmatpush.bf16.msra.mxu3 %v867_v30  ;;  %v863_v4 = vor.u32 %v1074_v2, %v860_v3  ;;  %v787_v8 = vor.u32 %v1057_v6, %v786_v5  ;;  %v1073_v9 = vld [vmem:[#allocation4 + $0x84] sm:$0xf0]  ;;  %v1056_v10 = vld [vmem:[#allocation4 + $0x4] sm:$0xf]  ;;  %v788_v11 = vld [vmem:[#allocation4 + $0x8] sm:$0xf0] }
  0x2d   :  { %196 = vmatpush.bf16.msra.mxu1 %v727_v19  ;;  %v851_v12 = vor.u32 %v1073_v9, %v850_v7  ;;  %v791_v13 = vor.u32 %v1056_v10, %v788_v11  ;;  %v1072_v14 = vld [vmem:[#allocation4 + $0x84] sm:$0xf]  ;;  %v852_v15 = vld [vmem:[#allocation4 + $0x88] sm:$0xf0]  ;;  %v1034_v17 = vld [vmem:[#allocation6 + $0xf0] sm:$0xf] }
  0x2e   :  { %410 = vmatpush.bf16.msra.mxu2 %v795_v60  ;;  %v855_v16 = vor.u32 %v1072_v14, %v852_v15  ;;  %v1119_v18 = vld [vmem:[#allocation6 + $0xf4] sm:$0xf0]  ;;  %v1118_v19 = vld [vmem:[#allocation6 + $0xf4] sm:$0xf]  ;;  %v1036_v21 = vld [vmem:[#allocation6 + $0xf8] sm:$0xf0] }
  0x2f   :  { %184 = vmatmul.bf16.vlgmr.msra.gmra.mxu0 %v73_v29  ;;  %v1026_v22 = vld [vmem:[#allocation6 + $0xe0] sm:$0xf]  ;;  %v1039_v24 = vor.u32 %v1118_v19, %v1036_v21  ;;  %v1116_v25 = vld [vmem:[#allocation6 + $0xe4] sm:$0xf]  ;;  %v1028_v26 = vld [vmem:[#allocation6 + $0xe8] sm:$0xf0] }
  0x30   :  { %430 = vmatpush.bf16.msrb.mxu0 %v847_v20  ;;  %197 = vmatmul.bf16.vlgmr.msra.gmra.mxu1 %v73_v29  ;;  %v1035_v20 = vor.u32 %v1119_v18, %v1034_v17  ;;  %v970_v27 = vld [vmem:[#allocation6 + $0x70] sm:$0xf]  ;;  %v1103_v29 = vld [vmem:[#allocation6 + $0x74] sm:$0xf0]  ;;  %v1102_v30 = vld [vmem:[#allocation6 + $0x74] sm:$0xf] }
  0x31   :  { %443 = vmatpush.bf16.msrb.mxu1 %v911_v23  ;;  %423 = vmatpush.bf16.msra.mxu3 %v859_v0  ;;  %v1117_v23 = vld [vmem:[#allocation6 + $0xe4] sm:$0xf0]  ;;  %v971_v33 = vor.u32 %v1103_v29, %v970_v27  ;;  %v1018_v35 = vld [vmem:[#allocation6 + $0xd0] sm:$0xf]  ;;  %v1115_v36 = vld [vmem:[#allocation6 + $0xd4] sm:$0xf0] }
  0x32   :  { %411 = vmatpush.bf16.msra.mxu2 %v787_v8  ;;  %v1027_v28 = vor.u32 %v1117_v23, %v1026_v22  ;;  %v962_v39 = vld [vmem:[#allocation6 + $0x60] sm:$0xf]  ;;  %v1101_v40 = vld [vmem:[#allocation6 + $0x64] sm:$0xf0]  ;;  %v1100_v42 = vld [vmem:[#allocation6 + $0x64] sm:$0xf] }
  0x33   :  { %v963_v41 = vor.u32 %v1101_v40, %v962_v39  ;;  %v1010_v46 = vld [vmem:[#allocation6 + $0xc0] sm:$0xf]  ;;  %v1113_v47 = vld [vmem:[#allocation6 + $0xc4] sm:$0xf0]  ;;  %v1098_v51 = vld [vmem:[#allocation6 + $0x54] sm:$0xf] }
  0x34   :  { %431 = vmatpush.bf16.msrb.mxu0 %v839_v31  ;;  %v972_v31 = vld [vmem:[#allocation6 + $0x78] sm:$0xf0]  ;;  %v1112_v52 = vld [vmem:[#allocation6 + $0xc4] sm:$0xf]  ;;  %v1012_v53 = vld [vmem:[#allocation6 + $0xc8] sm:$0xf0]  ;;  %v1011_v58 = vor.u32 %v1113_v47, %v1010_v46 }
  0x35   :  { %444 = vmatpush.bf16.msrb.mxu1 %v903_v32  ;;  %424 = vmatpush.bf16.msra.mxu3 %v851_v12  ;;  %v1031_v32 = vor.u32 %v1116_v25, %v1028_v26  ;;  %v975_v34 = vor.u32 %v1102_v30, %v972_v31  ;;  %v956_v54 = vld [vmem:[#allocation6 + $0x58] sm:$0xf0]  ;;  %v946_v57 = vld [vmem:[#allocation6 + $0x40] sm:$0xf]  ;;  %v1097_v59 = vld [vmem:[#allocation6 + $0x44] sm:$0xf0]  ;;  %v1015_v62 = vor.u32 %v1112_v52, %v1012_v53 }
  0x36   :  { %658 = vmatpush.bf16.msrb.mxu2 %v971_v33  ;;  %v1096_v60 = vld [vmem:[#allocation6 + $0x44] sm:$0xf]  ;;  %v948_v61 = vld [vmem:[#allocation6 + $0x48] sm:$0xf0]  ;;  %v1002_v63 = vld [vmem:[#allocation6 + $0xb0] sm:$0xf]  ;;  %v947_v3 = vor.u32 %v1097_v59, %v946_v57 }
  0x37   :  { %v1111_v0 = vld [vmem:[#allocation6 + $0xb4] sm:$0xf0]  ;;  %v1004_v2 = vld [vmem:[#allocation6 + $0xb8] sm:$0xf0]  ;;  %v994_v7 = vld [vmem:[#allocation6 + $0xa0] sm:$0xf] }
  0x38   :  { %432 = vmatpush.bf16.msrb.mxu0 %v831_v37  ;;  %v1114_v37 = vld [vmem:[#allocation6 + $0xd4] sm:$0xf]  ;;  %v1003_v5 = vor.u32 %v1111_v0, %v1002_v63  ;;  %v1109_v8 = vld [vmem:[#allocation6 + $0xa4] sm:$0xf0]  ;;  %v90_v9 = vld [vmem:[%s1275_s2] sm:$0x3] }
  0x39   :  { %445 = vmatpush.bf16.msrb.mxu1 %v895_v38  ;;  %671 = vmatpush.bf16.msrb.mxu3 %v1035_v20  ;;  %v1020_v38 = vld [vmem:[#allocation6 + $0xd8] sm:$0xf0]  ;;  %v1108_v10 = vld [vmem:[#allocation6 + $0xa4] sm:$0xf]  ;;  %v996_v11 = vld [vmem:[#allocation6 + $0xa8] sm:$0xf0]  ;;  %v995_v12 = vor.u32 %v1109_v8, %v994_v7 }
  0x3a   :  { %v1023_v48 = vor.u32 %v1114_v37, %v1020_v38  ;;  %659 = vmatpush.bf16.msrb.mxu2 %v963_v41  ;;  %v999_v14 = vor.u32 %v1108_v10, %v996_v11  ;;  %v93_v15 = vperm.slane %v90_v9, 1  ;;  %v938_v26 = vld [vmem:[#allocation6 + $0x30] sm:$0xf]  ;;  %v1095_v27 = vld [vmem:[#allocation6 + $0x34] sm:$0xf0] }
  0x3b   :  { %v939_v29 = vor.u32 %v1095_v27, %v938_v26  ;;  %v940_v30 = vld [vmem:[#allocation6 + $0x38] sm:$0xf0]  ;;  %v1107_v33 = vld [vmem:[#allocation6 + $0x94] sm:$0xf0]  ;;  %v930_v38 = vld [vmem:[#allocation6 + $0x20] sm:$0xf] }
  0x3c   :  { %433 = vmatpush.bf16.msrb.mxu0 %v823_v43  ;;  %v964_v43 = vld [vmem:[#allocation6 + $0x68] sm:$0xf0]  ;;  %v1093_v39 = vld [vmem:[#allocation6 + $0x24] sm:$0xf0]  ;;  %v1092_v40 = vld [vmem:[#allocation6 + $0x24] sm:$0xf] }
  0x3d   :  { %446 = vmatpush.bf16.msrb.mxu1 %v887_v44  ;;  %672 = vmatpush.bf16.msrb.mxu3 %v1027_v28  ;;  %v1019_v44 = vor.u32 %v1115_v36, %v1018_v35  ;;  %v967_v45 = vor.u32 %v1100_v42, %v964_v43  ;;  %v1094_v28 = vld [vmem:[#allocation6 + $0x34] sm:$0xf]  ;;  %v988_v36 = vld [vmem:[#allocation6 + $0x98] sm:$0xf0]  ;;  %v931_v41 = vor.u32 %v1093_v39, %v930_v38  ;;  %v932_v42 = vld [vmem:[#allocation6 + $0x28] sm:$0xf0] }
  0x3e   :  { %v943_v31 = vor.u32 %v1094_v28, %v940_v30  ;;  %v935_v43 = vor.u32 %v1092_v40, %v932_v42  ;;  %v1104_v46 = vld [vmem:[#allocation6 + $0x84] sm:$0xf]  ;;  %v1090_v53 = vld [vmem:[#allocation6 + $0x14] sm:$0xf]  ;;  %v1089_v57 = vld [vmem:[#allocation6 + $0x4] sm:$0xf0] }
  0x40   :  { %434 = vmatpush.bf16.msrb.mxu0 %v815_v49  ;;  %v954_v49 = vld [vmem:[#allocation6 + $0x50] sm:$0xf] }
  0x41   :  { %447 = vmatpush.bf16.msrb.mxu1 %v879_v50  ;;  %v1099_v50 = vld [vmem:[#allocation6 + $0x54] sm:$0xf0]  ;;  %673 = vmatpush.bf16.msrb.mxu3 %v1019_v44  ;;  %v978_v44 = vld [vmem:[#allocation6 + $0x80] sm:$0xf] }
  0x44   :  { %435 = vmatpush.bf16.msrb.mxu0 %v807_v55  ;;  %v955_v55 = vor.u32 %v1099_v50, %v954_v49  ;;  %v922_v50 = vld [vmem:[#allocation6 + $0x10] sm:$0xf] }
  0x45   :  { %448 = vmatpush.bf16.msrb.mxu1 %v871_v56  ;;  %v959_v56 = vor.u32 %v1098_v51, %v956_v54  ;;  %674 = vmatpush.bf16.msrb.mxu3 %v1011_v58  ;;  %v1091_v51 = vld [vmem:[#allocation6 + $0x14] sm:$0xf0]  ;;  %v924_v54 = vld [vmem:[#allocation6 + $0x18] sm:$0xf0]  ;;  %v1088_v58 = vld [vmem:[#allocation6 + $0x4] sm:$0xf] }
  0x46   :  { %660 = vmatpush.bf16.msrb.mxu2 %v955_v55  ;;  %v923_v52 = vor.u32 %v1091_v51, %v922_v50  ;;  %v927_v55 = vor.u32 %v1090_v53, %v924_v54 }
  0x48   :  { %436 = vmatpush.bf16.msrb.mxu0 %v799_v1  ;;  %v1110_v1 = vld [vmem:[#allocation6 + $0xb4] sm:$0xf] }
  0x49   :  { %449 = vmatpush.bf16.msrb.mxu1 %v863_v4  ;;  %v951_v4 = vor.u32 %v1096_v60, %v948_v61  ;;  %v1007_v6 = vor.u32 %v1110_v1, %v1004_v2  ;;  %675 = vmatpush.bf16.msrb.mxu3 %v1003_v5  ;;  %v916_v60 = vld [vmem:[#allocation6 + $0x8] sm:$0xf0] }
  0x4a   :  { %661 = vmatpush.bf16.msrb.mxu2 %v947_v3  ;;  %v919_v61 = vor.u32 %v1088_v58, %v916_v60 }
  0x4c   :  { %437 = vmatpush.bf16.msrb.mxu0 %v791_v13  ;;  %v92_v13 = vperm.slane %v90_v9, 0 }
  0x4d   :  { %450 = vmatpush.bf16.msrb.mxu1 %v855_v16  ;;  %676 = vmatpush.bf16.msrb.mxu3 %v995_v12 }
  0x4e   :  { %662 = vmatpush.bf16.msrb.mxu2 %v939_v29 }
  0x50   :  { %684 = vmatpush.bf16.msra.mxu0 %v975_v34  ;;  %v1106_v34 = vld [vmem:[#allocation6 + $0x94] sm:$0xf] }
  0x51   :  { %697 = vmatpush.bf16.msra.mxu1 %v1039_v24  ;;  %v991_v37 = vor.u32 %v1106_v34, %v988_v36 }
  0x52   :  { %663 = vmatpush.bf16.msrb.mxu2 %v931_v41 }
  0x54   :  { %685 = vmatpush.bf16.msra.mxu0 %v967_v45  ;;  %v1105_v45 = vld [vmem:[#allocation6 + $0x84] sm:$0xf0] }
  0x55   :  { %698 = vmatpush.bf16.msra.mxu1 %v1031_v32  ;;  %v986_v32 = vld [vmem:[#allocation6 + $0x90] sm:$0xf]  ;;  %v979_v47 = vor.u32 %v1105_v45, %v978_v44 }
  0x56   :  { %v987_v35 = vor.u32 %v1107_v33, %v986_v32  ;;  %664 = vmatpush.bf16.msrb.mxu2 %v923_v52 }
  0x58   :  { %686 = vmatpush.bf16.msra.mxu0 %v959_v56  ;;  %677 = vmatpush.bf16.msrb.mxu3 %v987_v35  ;;  %v914_v56 = vld [vmem:[#allocation6] sm:$0xf] }
  0x59   :  { %699 = vmatpush.bf16.msra.mxu1 %v1023_v48  ;;  %v980_v48 = vld [vmem:[#allocation6 + $0x88] sm:$0xf0]  ;;  %v915_v59 = vor.u32 %v1089_v57, %v914_v56 }
  0x5a   :  { %v983_v49 = vor.u32 %v1104_v46, %v980_v48 }
  0x5b   :  { %665 = vmatpush.bf16.msrb.mxu2 %v915_v59 }
  0x5c   :  { %687 = vmatpush.bf16.msra.mxu0 %v951_v4  ;;  %678 = vmatpush.bf16.msrb.mxu3 %v979_v47 }
  0x5d   :  { %700 = vmatpush.bf16.msra.mxu1 %v1015_v62  ;;  %v238_v62 = vld [vmem:[%s1277_s4] sm:$0x3] }
  0x5e   :  { %v241_v63 = vperm.slane %v238_v62, 1  ;;  %v240_v4 = vperm.slane %v238_v62, 0 }
  0x60   :  { %688 = vmatpush.bf16.msra.mxu0 %v943_v31 }
  0x61   :  { %701 = vmatpush.bf16.msra.mxu1 %v1007_v6 }
  0x64   :  { %689 = vmatpush.bf16.msra.mxu0 %v935_v43 }
  0x65   :  { %702 = vmatpush.bf16.msra.mxu1 %v999_v14 }
  0x68   :  { %690 = vmatpush.bf16.msra.mxu0 %v927_v55 }
  0x69   :  { %703 = vmatpush.bf16.msra.mxu1 %v991_v37 }
  0x6c   :  { %691 = vmatpush.bf16.msra.mxu0 %v919_v61 }
  0x6d   :  { %704 = vmatpush.bf16.msra.mxu1 %v983_v49 }
  0xac   :  { %v185_v16 = vpop.f32.mrf.mxu0 }
  0xad   :  { %v186_v17 = vadd.f32 %v185_v16, %v92_v13  ;;  %v198_v18 = vpop.f32.mrf.mxu1 }
  0xae   :  { %v199_v19 = vadd.f32 %v198_v18, %v93_v15  ;;  %v492_v18 = vld [vmem:[%s1279_s6] sm:$0x3] }
  0xaf   :  { %v202_v20 = vmax.f32 %v186_v17, 0.0 }
  0xb0   :  { %v203_v21 = vmax.f32 %v199_v19, 0.0  ;;  %v495_v19 = vperm.slane %v492_v18, 1 }
  0xb1   :  { %v204_v22 = vpack.c.bf16 %v202_v20, %v202_v20 }
  0xb2   :  { %v205_v23 = vpack.c.bf16 %v203_v21, %v203_v21 }
  0xb3   :  { %412 = vmatmul.bf16.vlgmr.msra.gmra.mxu2 %v204_v22  ;;  %438 = vmatmul.bf16.vlgmr.msrb.gmra.mxu0 %v204_v22 }
  0xb4   :  { %425 = vmatmul.bf16.vlgmr.msra.gmra.mxu3 %v205_v23  ;;  %451 = vmatmul.bf16.vlgmr.msrb.gmra.mxu1 %v205_v23  ;;  %v187_v24 = vpop.f32.mrf.mxu0 }
  0xb5   :  { %v200_v25 = vpop.f32.mrf.mxu1 }
  0xb6   :  { %v494_v25 = vperm.slane %v492_v18, 0 }
 0x130   :  { %v439_v0 = vpop.f32.mrf.mxu0 }
 0x131   :  { %v440_v1 = vadd.f32 %v439_v0, %v241_v63  ;;  %v452_v2 = vpop.f32.mrf.mxu1 }
 0x133   :  { %v453_v3 = vadd.f32 %v452_v2, %v440_v1 }
 0x135   :  { %v457_v5 = vmax.f32 %v453_v3, 0.0 }
 0x136   :  { %v413_v6 = vpop.f32.mrf.mxu2 }
 0x137   :  { %v459_v7 = vpack.c.bf16 %v457_v5, %v457_v5  ;;  %v414_v8 = vadd.f32 %v413_v6, %v240_v4  ;;  %v426_v9 = vpop.f32.mrf.mxu3 }
 0x138   :  { %v441_v10 = vpop.f32.mrf.mxu0 }
 0x139   :  { %v427_v11 = vadd.f32 %v426_v9, %v414_v8  ;;  %v454_v12 = vpop.f32.mrf.mxu1  ;;  %679 = vmatmul.bf16.vlgmr.msrb.gmra.mxu3 %v459_v7  ;;  %705 = vmatmul.bf16.vlgmr.msra.gmra.mxu1 %v459_v7 }
 0x13b   :  { %v456_v13 = vmax.f32 %v427_v11, 0.0 }
 0x13d   :  { %v458_v14 = vpack.c.bf16 %v456_v13, %v456_v13 }
 0x13e   :  { %v415_v15 = vpop.f32.mrf.mxu2 }
 0x13f   :  { %v428_v16 = vpop.f32.mrf.mxu3  ;;  %666 = vmatmul.bf16.vlgmr.msrb.gmra.mxu2 %v458_v14  ;;  %692 = vmatmul.bf16.vlgmr.msra.gmra.mxu0 %v458_v14 }
 0x1b6   :  { %v706_v17 = vpop.f32.mrf.mxu1 }
 0x1bc   :  { %v680_v20 = vpop.f32.mrf.mxu3  ;;  %v693_v21 = vpop.f32.mrf.mxu0 }
 0x1bd   :  { %v694_v22 = vadd.f32 %v693_v21, %v495_v19 }
 0x1be   :  { %v708_v23 = vpop.f32.mrf.mxu1 }
 0x1bf   :  { %v707_v24 = vadd.f32 %v706_v17, %v694_v22 }
 0x1c1   :  { %v711_v26 = vmax.f32 %v707_v24, 0.0 }
 0x1c2   :  { %v667_v27 = vpop.f32.mrf.mxu2 }
 0x1c3   :  { %713 = vst [vmem:[%s1280_s7 + $0x8] sm:$0xff] %v711_v26  ;;  %v668_v28 = vadd.f32 %v667_v27, %v494_v25 }
 0x1c4   :  { %v682_v29 = vpop.f32.mrf.mxu3  ;;  %v695_v30 = vpop.f32.mrf.mxu0 }
 0x1c5   :  { %v681_v31 = vadd.f32 %v680_v20, %v668_v28 }
 0x1c7   :  { %v710_v32 = vmax.f32 %v681_v31, 0.0 }
 0x1c9   :  { %712 = vst [vmem:[%s1280_s7] sm:$0xff] %v710_v32 }
 0x1ca   :  { %v669_v33 = vpop.f32.mrf.mxu2 }
 0x1cb   :  { %718 = vsyncpa [#allocation3], 1 }
 0x1cc   :  { %719 = vsyncpa [#allocation5], 1 }

</bundles_post_ra>
